<compile_context>
chip_gen: v5e
topology: v5e:2x2
jax: 0.10.0
libtpu: 0.0.40
codegen_flags: <defaults>
</compile_context>

<pallas_src>
import jax
import jax.numpy as jnp
from jax.experimental import pallas as pl
from jax.experimental.pallas import tpu as pltpu


def _round_up(n, m):
    return ((n + m - 1) // m) * m


def _head_kernel(x_ref, w1_ref, b1_ref, w2_ref, b2_ref, o_ref):
    # Cast the x tile to the MXU compute dtype in vregs (no-op on the f32 path);
    # x's HBM traffic stays at its original width.
    x = x_ref[...].astype(w1_ref.dtype)
    # linear1 (MXU), f32 accumulation.
    h = jnp.dot(x, w1_ref[...], preferred_element_type=jnp.float32)
    # bias + tanh in f32 (EUP; safe on v5e which has no bf16 VPU/EUP).
    h = jnp.tanh(h + b1_ref[...])
    # linear2 (MXU), f32 accumulation; w2/b2 are lane-padded (VMEM only).
    y = jnp.dot(h.astype(w2_ref.dtype), w2_ref[...],
                preferred_element_type=jnp.float32)
    y = y + b2_ref[...]
    # HBM output is un-padded: store only the real O columns.
    o = o_ref.shape[-1]
    o_ref[...] = y[:, :o].astype(o_ref.dtype)


def classification_head(x, w1, b1, w2, b2, *, bm=512, compute_dtype=None,
                        out_dtype=None, vmem_limit_bytes=None):
    """Fused MLP head: tanh(x @ w1 + b1) @ w2 + b2.

    x  : (B, D)
    w1 : (D, H)   (PyTorch linear1.weight.T)        b1 : (H,)
    w2 : (H, O)   (PyTorch linear2.weight.T)        b2 : (O,)
    bm : row tile (default 512 fits v7x's 64 MiB VMEM; sweep 512-2048 elsewhere).
    compute_dtype : jnp.bfloat16 recommended on v5e/v6e/v7x (all bf16-native MXUs);
                    only the weights are cast in the wrapper, the x tile is cast
                    in-kernel; accumulation / bias / tanh stay f32.
    vmem_limit_bytes : raise the scoped-VMEM limit (v5e default 16 MiB) if needed.
    returns (B, O)
    """
    B, D = x.shape
    Dw, H = w1.shape
    Hw, O = w2.shape
    assert Dw == D and Hw == H
    out_dtype = out_dtype or x.dtype

    # Cast only the (small, VMEM-resident, grid-invariant) weights here.
    if compute_dtype is not None:
        w1 = w1.astype(compute_dtype)
        w2 = w2.astype(compute_dtype)

    # Lane-dense w2/b2 in VMEM only; HBM output stays un-padded (O columns).
    O_pad = _round_up(max(O, 128), 128)
    if O_pad != O:
        w2 = jnp.pad(w2, ((0, 0), (0, O_pad - O)))
        b2 = jnp.pad(b2, (0, O_pad - O))
    b1_2d = b1.reshape(1, H).astype(jnp.float32)
    b2_2d = b2.reshape(1, O_pad).astype(jnp.float32)

    # Minimal batch padding + a grid that divides exactly.  Force >=2 steps for
    # larger B so the "parallel" axis shards across both v7x TensorCores.
    B8 = _round_up(B, 8)
    n_steps = pl.cdiv(B8, bm)
    if B8 >= 512:
        n_steps = max(n_steps, 2)
    bm_eff = _round_up(pl.cdiv(B8, n_steps), 8)
    B_pad = bm_eff * n_steps
    if B_pad != B:
        x = jnp.pad(x, ((0, B_pad - B), (0, 0)))   # at most ~8*n_steps pad rows

    in_isz = jnp.dtype(x.dtype).itemsize
    w_isz = jnp.dtype(w1.dtype).itemsize
    out_isz = jnp.dtype(out_dtype).itemsize
    cost = pl.CostEstimate(
        flops=2 * B_pad * D * H + 2 * B_pad * H * O,
        transcendentals=B_pad * H,
        bytes_accessed=(B_pad * D * in_isz + D * H * w_isz + H * O_pad * w_isz
                        + (H + O_pad) * 4 + B_pad * O * out_isz),
    )

    def _build(single_buffer_weights):
        def const_spec(shape):
            # Grid-invariant operands never re-fetch; one pipeline buffer is enough.
            if single_buffer_weights:
                return pl.BlockSpec(shape, lambda i: (0, 0),
                                    pipeline_mode=pl.Buffered(1))
            return pl.BlockSpec(shape, lambda i: (0, 0))

        return pl.pallas_call(
            _head_kernel,
            out_shape=jax.ShapeDtypeStruct((B_pad, O), out_dtype),
            grid_spec=pl.GridSpec(
                grid=(B_pad // bm_eff,),
                in_specs=[
                    pl.BlockSpec((bm_eff, D), lambda i: (i, 0)),   # x row tile
                    const_spec((D, H)),                            # w1 (resident)
                    const_spec((1, H)),                            # b1
                    const_spec((H, O_pad)),                        # w2 (lane-padded)
                    const_spec((1, O_pad)),                        # b2 (lane-padded)
                ],
                out_specs=pl.BlockSpec((bm_eff, O), lambda i: (i, 0)),
            ),
            compiler_params=pltpu.CompilerParams(
                dimension_semantics=("parallel",),      # shards batch over v7x TCs
                vmem_limit_bytes=vmem_limit_bytes,
            ),
            cost_estimate=cost,
        )

    try:
        out = _build(True)(x, w1, b1_2d, w2, b2_2d)
    except Exception:
        # pl.Buffered(1) not supported by this jax/Mosaic build: fall back to the
        # default double-buffered weights (same semantics, slightly more VMEM).
        out = _build(False)(x, w1, b1_2d, w2, b2_2d)

    # Only the cheap row slice remains (and only when B isn't a multiple of 8).
    return out if B_pad == B else out[:B]


if __name__ == "__main__":
    # Small shapes consistent with ClassificationHead(input_dim=32, out_dim=8,
    # inner_dim=128); the module's default inner_dim is 1024, shrunk for the demo.
    B, D, H, O = 16, 32, 128, 8

    key = jax.random.PRNGKey(0)
    kx, kw1, kb1, kw2, kb2 = jax.random.split(key, 5)

    x = jax.random.normal(kx, (B, D), dtype=jnp.float32)
    # PyTorch-Linear-like init, stored pre-transposed as (in, out).
    w1 = jax.random.uniform(kw1, (D, H), jnp.float32, -1.0, 1.0) / jnp.sqrt(D)
    b1 = jax.random.uniform(kb1, (H,), jnp.float32, -1.0, 1.0) / jnp.sqrt(D)
    w2 = jax.random.uniform(kw2, (H, O), jnp.float32, -1.0, 1.0) / jnp.sqrt(H)
    b2 = jax.random.uniform(kb2, (O,), jnp.float32, -1.0, 1.0) / jnp.sqrt(H)

    out = classification_head(x, w1, b1, w2, b2)   # B=16 -> grid=(1,), no padding
    out = jax.block_until_ready(out)

    # Pure-JAX reference (f32 path -> tight tolerance).
    ref = jnp.tanh(x @ w1 + b1) @ w2 + b2
    assert out.shape == (B, O)
    assert jnp.allclose(out, ref, atol=1e-5, rtol=1e-5), "mismatch vs reference"

    print("KERNEL_OK")
</pallas_src>

<mosaic_0001>
module attributes {stable_mosaic.version = 11 : i64} {
  func.func @_head_kernel(%arg0: i32, %arg1: memref<16x32xf32, #tpu.memory_space<vmem>>, %arg2: memref<32x128xf32, #tpu.memory_space<vmem>>, %arg3: memref<1x128xf32, #tpu.memory_space<vmem>>, %arg4: memref<128x128xf32, #tpu.memory_space<vmem>>, %arg5: memref<1x128xf32, #tpu.memory_space<vmem>>, %arg6: memref<16x8xf32, #tpu.memory_space<vmem>>) attributes {dimension_semantics = [#tpu.dimension_semantics<parallel>], iteration_bounds = array<i64: 1>, scalar_prefetch = 0 : i64, scratch_operands = 0 : i64, tpu.core_type = #tpu.core_type<tc>, window_params = [{transform_indices = @transform_0, window_bounds = array<i64: 16, 32>}, {pipeline_mode = #tpu.pipeline_mode<synchronous>, transform_indices = @transform_1, window_bounds = array<i64: 32, 128>}, {pipeline_mode = #tpu.pipeline_mode<synchronous>, transform_indices = @transform_2, window_bounds = array<i64: 1, 128>}, {pipeline_mode = #tpu.pipeline_mode<synchronous>, transform_indices = @transform_3, window_bounds = array<i64: 128, 128>}, {pipeline_mode = #tpu.pipeline_mode<synchronous>, transform_indices = @transform_4, window_bounds = array<i64: 1, 128>}, {transform_indices = @transform_5, window_bounds = array<i64: 16, 8>}]} {
    %c0 = arith.constant 0 : index
    %c0_0 = arith.constant 0 : index
    %0 = vector.load %arg1[%c0, %c0_0] : memref<16x32xf32, #tpu.memory_space<vmem>>, vector<16x32xf32>
    %c0_1 = arith.constant 0 : index
    %c0_2 = arith.constant 0 : index
    %1 = vector.load %arg2[%c0_1, %c0_2] : memref<32x128xf32, #tpu.memory_space<vmem>>, vector<32x128xf32>
    %cst = arith.constant dense<0.000000e+00> : vector<16x128xf32>
    %2 = tpu.matmul %0, %1, %cst {dimension_numbers = #tpu.dot_dimension_numbers<[1], [0], [0], [1], [0, 0, 1, 1], [], []>} : vector<16x32xf32>, vector<32x128xf32>, vector<16x128xf32> -> vector<16x128xf32>
    %c0_3 = arith.constant 0 : index
    %c0_4 = arith.constant 0 : index
    %3 = vector.load %arg3[%c0_3, %c0_4] : memref<1x128xf32, #tpu.memory_space<vmem>>, vector<1x128xf32>
    %4 = vector.broadcast %3 : vector<1x128xf32> to vector<16x128xf32>
    %5 = arith.addf %2, %4 : vector<16x128xf32>
    %6 = math.tanh %5 : vector<16x128xf32>
    %c0_5 = arith.constant 0 : index
    %c0_6 = arith.constant 0 : index
    %7 = vector.load %arg4[%c0_5, %c0_6] : memref<128x128xf32, #tpu.memory_space<vmem>>, vector<128x128xf32>
    %cst_7 = arith.constant dense<0.000000e+00> : vector<16x128xf32>
    %8 = tpu.matmul %6, %7, %cst_7 {dimension_numbers = #tpu.dot_dimension_numbers<[1], [0], [0], [1], [0, 0, 1, 1], [], []>} : vector<16x128xf32>, vector<128x128xf32>, vector<16x128xf32> -> vector<16x128xf32>
    %c0_8 = arith.constant 0 : index
    %c0_9 = arith.constant 0 : index
    %9 = vector.load %arg5[%c0_8, %c0_9] : memref<1x128xf32, #tpu.memory_space<vmem>>, vector<1x128xf32>
    %10 = vector.broadcast %9 : vector<1x128xf32> to vector<16x128xf32>
    %11 = arith.addf %8, %10 : vector<16x128xf32>
    %12 = vector.extract_strided_slice %11 {offsets = [0, 0], sizes = [16, 8], strides = [1, 1]} : vector<16x128xf32> to vector<16x8xf32>
    %c0_10 = arith.constant 0 : index
    %c0_11 = arith.constant 0 : index
    %13 = vector.load %arg6[%c0_10, %c0_11] : memref<16x8xf32, #tpu.memory_space<vmem>>, vector<16x8xf32>
    tpu.vector_store %arg6[%c0_10, %c0_11], %12 {strides = array<i32>} : memref<16x8xf32, #tpu.memory_space<vmem>>, vector<16x8xf32>,
    return
  }
  func.func @transform_0(%arg0: i32) -> (i32, i32) {
    %c0_i32 = arith.constant 0 : i32
    %c0_i32_0 = arith.constant 0 : i32
    return %arg0, %c0_i32 : i32, i32
  }
  func.func @transform_1(%arg0: i32) -> (i32, i32) {
    %c0_i32 = arith.constant 0 : i32
    %c0_i32_0 = arith.constant 0 : i32
    %c0_i32_1 = arith.constant 0 : i32
    return %c0_i32, %c0_i32_0 : i32, i32
  }
  func.func @transform_2(%arg0: i32) -> (i32, i32) {
    %c0_i32 = arith.constant 0 : i32
    %c0_i32_0 = arith.constant 0 : i32
    %c0_i32_1 = arith.constant 0 : i32
    return %c0_i32, %c0_i32_0 : i32, i32
  }
  func.func @transform_3(%arg0: i32) -> (i32, i32) {
    %c0_i32 = arith.constant 0 : i32
    %c0_i32_0 = arith.constant 0 : i32
    %c0_i32_1 = arith.constant 0 : i32
    return %c0_i32, %c0_i32_0 : i32, i32
  }
  func.func @transform_4(%arg0: i32) -> (i32, i32) {
    %c0_i32 = arith.constant 0 : i32
    %c0_i32_0 = arith.constant 0 : i32
    %c0_i32_1 = arith.constant 0 : i32
    return %c0_i32, %c0_i32_0 : i32, i32
  }
  func.func @transform_5(%arg0: i32) -> (i32, i32) {
    %c0_i32 = arith.constant 0 : i32
    %c0_i32_0 = arith.constant 0 : i32
    return %arg0, %c0_i32 : i32, i32
  }
}

module attributes {stable_mosaic.version = 11 : i64} {
  func.func @_head_kernel(%arg0: i32, %arg1: memref<16x32xf32, #tpu.memory_space<vmem>>, %arg2: memref<32x128xf32, #tpu.memory_space<vmem>>, %arg3: memref<1x128xf32, #tpu.memory_space<vmem>>, %arg4: memref<128x128xf32, #tpu.memory_space<vmem>>, %arg5: memref<1x128xf32, #tpu.memory_space<vmem>>, %arg6: memref<16x8xf32, #tpu.memory_space<vmem>>) attributes {dimension_semantics = [#tpu.dimension_semantics<parallel>], iteration_bounds = array<i64: 1>, scalar_prefetch = 0 : i64, scratch_operands = 0 : i64, tpu.core_type = #tpu.core_type<tc>, window_params = [{transform_indices = @transform_0, window_bounds = array<i64: 16, 32>}, {pipeline_mode = #tpu.pipeline_mode<synchronous>, transform_indices = @transform_1, window_bounds = array<i64: 32, 128>}, {pipeline_mode = #tpu.pipeline_mode<synchronous>, transform_indices = @transform_2, window_bounds = array<i64: 1, 128>}, {pipeline_mode = #tpu.pipeline_mode<synchronous>, transform_indices = @transform_3, window_bounds = array<i64: 128, 128>}, {pipeline_mode = #tpu.pipeline_mode<synchronous>, transform_indices = @transform_4, window_bounds = array<i64: 1, 128>}, {transform_indices = @transform_5, window_bounds = array<i64: 16, 8>}]} {
    %c0 = arith.constant 0 : index
    %c0_0 = arith.constant 0 : index
    %0 = vector.load %arg1[%c0, %c0_0] : memref<16x32xf32, #tpu.memory_space<vmem>>, vector<16x32xf32>
    %c0_1 = arith.constant 0 : index
    %c0_2 = arith.constant 0 : index
    %1 = vector.load %arg2[%c0_1, %c0_2] : memref<32x128xf32, #tpu.memory_space<vmem>>, vector<32x128xf32>
    %cst = arith.constant dense<0.000000e+00> : vector<16x128xf32>
    %2 = tpu.matmul %0, %1, %cst {dimension_numbers = #tpu.dot_dimension_numbers<[1], [0], [0], [1], [0, 0, 1, 1], [], []>} : vector<16x32xf32>, vector<32x128xf32>, vector<16x128xf32> -> vector<16x128xf32>
    %c0_3 = arith.constant 0 : index
    %c0_4 = arith.constant 0 : index
    %3 = vector.load %arg3[%c0_3, %c0_4] : memref<1x128xf32, #tpu.memory_space<vmem>>, vector<1x128xf32>
    %4 = vector.broadcast %3 : vector<1x128xf32> to vector<16x128xf32>
    %5 = arith.addf %2, %4 : vector<16x128xf32>
    %6 = math.tanh %5 : vector<16x128xf32>
    %c0_5 = arith.constant 0 : index
    %c0_6 = arith.constant 0 : index
    %7 = vector.load %arg4[%c0_5, %c0_6] : memref<128x128xf32, #tpu.memory_space<vmem>>, vector<128x128xf32>
    %cst_7 = arith.constant dense<0.000000e+00> : vector<16x128xf32>
    %8 = tpu.matmul %6, %7, %cst_7 {dimension_numbers = #tpu.dot_dimension_numbers<[1], [0], [0], [1], [0, 0, 1, 1], [], []>} : vector<16x128xf32>, vector<128x128xf32>, vector<16x128xf32> -> vector<16x128xf32>
    %c0_8 = arith.constant 0 : index
    %c0_9 = arith.constant 0 : index
    %9 = vector.load %arg5[%c0_8, %c0_9] : memref<1x128xf32, #tpu.memory_space<vmem>>, vector<1x128xf32>
    %10 = vector.broadcast %9 : vector<1x128xf32> to vector<16x128xf32>
    %11 = arith.addf %8, %10 : vector<16x128xf32>
    %12 = vector.extract_strided_slice %11 {offsets = [0, 0], sizes = [16, 8], strides = [1, 1]} : vector<16x128xf32> to vector<16x8xf32>
    %c0_10 = arith.constant 0 : index
    %c0_11 = arith.constant 0 : index
    %13 = vector.load %arg6[%c0_10, %c0_11] : memref<16x8xf32, #tpu.memory_space<vmem>>, vector<16x8xf32>
    tpu.vector_store %arg6[%c0_10, %c0_11], %12 {strides = array<i32>} : memref<16x8xf32, #tpu.memory_space<vmem>>, vector<16x8xf32>,
    return
  }
  func.func @transform_0(%arg0: i32) -> (i32, i32) {
    %c0_i32 = arith.constant 0 : i32
    %c0_i32_0 = arith.constant 0 : i32
    return %arg0, %c0_i32 : i32, i32
  }
  func.func @transform_1(%arg0: i32) -> (i32, i32) {
    %c0_i32 = arith.constant 0 : i32
    %c0_i32_0 = arith.constant 0 : i32
    %c0_i32_1 = arith.constant 0 : i32
    return %c0_i32, %c0_i32_0 : i32, i32
  }
  func.func @transform_2(%arg0: i32) -> (i32, i32) {
    %c0_i32 = arith.constant 0 : i32
    %c0_i32_0 = arith.constant 0 : i32
    %c0_i32_1 = arith.constant 0 : i32
    return %c0_i32, %c0_i32_0 : i32, i32
  }
  func.func @transform_3(%arg0: i32) -> (i32, i32) {
    %c0_i32 = arith.constant 0 : i32
    %c0_i32_0 = arith.constant 0 : i32
    %c0_i32_1 = arith.constant 0 : i32
    return %c0_i32, %c0_i32_0 : i32, i32
  }
  func.func @transform_4(%arg0: i32) -> (i32, i32) {
    %c0_i32 = arith.constant 0 : i32
    %c0_i32_0 = arith.constant 0 : i32
    %c0_i32_1 = arith.constant 0 : i32
    return %c0_i32, %c0_i32_0 : i32, i32
  }
  func.func @transform_5(%arg0: i32) -> (i32, i32) {
    %c0_i32 = arith.constant 0 : i32
    %c0_i32_0 = arith.constant 0 : i32
    return %arg0, %c0_i32 : i32, i32
  }
}

</mosaic_0001>

<bundles_post_ra>
// kernel: tpu_custom_call.1
= control target key start
LH: loop header
LB: loop body
LE: loop exit
PB: predicated region body
PF: predicated region fallthrough
CT: control target
= control target key end

     0   :  { %10 = vsyncpa [#allocation3], 0  ;;  %s324_s0 = inlined_call_operand.hbm [shape: f32[16,32], index: 0, kind: input, shape index: {}]   ;;  %s325_s1 = inlined_call_operand.hbm [shape: f32[32,128], index: 1, kind: input, shape index: {}]   ;;  %s326_s2 = inlined_call_operand.vmem [shape: f32[1,128], index: 2, kind: input, shape index: {}]   ;;  %s327_s3 = inlined_call_operand.hbm [shape: f32[128,128], index: 3, kind: input, shape index: {}]   ;;  %s328_s4 = inlined_call_operand.vmem [shape: f32[1,128], index: 4, kind: input, shape index: {}]   ;;  %s329_s5 = inlined_call_operand.vmem [shape: f32[16,8], index: 5, kind: output, shape index: {}]  }
   0x1   :  { %11 = vsyncpa [#allocation5], 0  ;;  %s29_s20 = sshll.u32 %s325_s1, 4  ;;  %s266_s21 = smov [#allocation4]   ;;  %s30_s20 = int_to_ptr.hbm [resolvable:$true] %s29_s20 }
   0x2   :  { %s31_s22 = sshll.u32 %s266_s21, 4  ;;  %s16_s25 = sshll.u32 %s324_s0, 4  ;;  %s32_s22 = int_to_ptr.vmem [resolvable:$true] %s31_s22  ;;  %s17_s25 = int_to_ptr.hbm [resolvable:$true] %s16_s25 }
   0x3   :  { %s267_s26 = smov 128   ;;  %s268_s27 = smov 8  }
   0x4   :  { %37 = dma.hbm_to_vmem [thread:$0]  %s30_s20, 512, %s32_s22, [#allocation5], %s267_s26, %s267_s26, %s268_s27  }
   0x5   :  { %s269_s28 = smov [#allocation2]   ;;  %s44_s7 = sshll.u32 %s327_s3, 4  ;;  %s45_s7 = int_to_ptr.hbm [resolvable:$true] %s44_s7 }
   0x6   :  { %s18_s29 = sshll.u32 %s269_s28, 4  ;;  %s270_s1 = smov [#allocation6]   ;;  %s19_s29 = int_to_ptr.vmem [resolvable:$true] %s18_s29 }
   0x7   :  { %24 = dma.hbm_to_vmem [thread:$0]  %s17_s25, 256, %s19_s29, [#allocation3], %s267_s26, %s267_s26, %s268_s27  }
   0x8   :  { %s46_s8 = sshll.u32 %s270_s1, 4  ;;  %s47_s8 = int_to_ptr.vmem [resolvable:$true] %s46_s8 }
   0x9   :  { %52 = dma.hbm_to_vmem [thread:$0]  %s45_s7, 2048, %s47_s8, [#allocation5], %s267_s26, %s267_s26, %s268_s27  }
   0xa   :  { %262 = dma.done.wait [#allocation3], 256  }
   0xb   :  { %263 = vsyncadd [#allocation3], 4294967040 }
   0xc   :  { %264 = dma.done.wait [#allocation5], 2560  }
   0xd   :  { %265 = vsyncadd [#allocation5], 4294964736  ;;  %v72_v0 = vld [vmem:[#allocation4 + $0x18] sm:$0xff]  ;;  %v71_v1 = vld [vmem:[#allocation4 + $0x10] sm:$0xff]  ;;  %vm77_vm0 = vcmask 261120   ;;  %vm152_vm1 = vcmask 64512  }
   0xe   :  { %96 = vmatpush.msra.mxu0 %v72_v0  ;;  %v70_v2 = vld [vmem:[#allocation4 + $0x8] sm:$0xff]  ;;  %v124_v3 = vld [vmem:[#allocation6 + $0x78] sm:$0xff]  ;;  %v123_v4 = vld [vmem:[#allocation6 + $0x70] sm:$0xff] }
   0xf   :  { %129 = vmatpush.msra.mxu1 %v124_v3  ;;  %v69_v5 = vld [vmem:[#allocation4] sm:$0xff]  ;;  %v122_v6 = vld [vmem:[#allocation6 + $0x68] sm:$0xff]  ;;  %163 = vmatpush.msra.mxu2 %v124_v3  ;;  %v67_v7 = vld [vmem:[#allocation2] sm:$0xff] }
  0x10   :  { %97 = vmatpush.msra.mxu0 %v71_v1  ;;  %v121_v8 = vld [vmem:[#allocation6 + $0x60] sm:$0xff]  ;;  %v120_v9 = vld [vmem:[#allocation6 + $0x58] sm:$0xff]  ;;  %v119_v10 = vld [vmem:[#allocation6 + $0x50] sm:$0xff] }
  0x11   :  { %130 = vmatpush.msra.mxu1 %v123_v4  ;;  %164 = vmatpush.msra.mxu2 %v123_v4  ;;  %v118_v11 = vld [vmem:[#allocation6 + $0x48] sm:$0xff]  ;;  %v68_v12 = vld [vmem:[#allocation2 + $0x8] sm:$0xff]  ;;  %v117_v13 = vld [vmem:[#allocation6 + $0x40] sm:$0xff] }
  0x12   :  { %98 = vmatpush.msra.mxu0 %v70_v2  ;;  %v116_v14 = vld [vmem:[#allocation6 + $0x38] sm:$0xff]  ;;  %v115_v15 = vld [vmem:[#allocation6 + $0x30] sm:$0xff]  ;;  %v114_v16 = vld [vmem:[#allocation6 + $0x28] sm:$0xff] }
  0x13   :  { %131 = vmatpush.msra.mxu1 %v122_v6  ;;  %165 = vmatpush.msra.mxu2 %v122_v6  ;;  %v113_v17 = vld [vmem:[#allocation6 + $0x20] sm:$0xff]  ;;  %v112_v18 = vld [vmem:[#allocation6 + $0x18] sm:$0xff]  ;;  %v111_v19 = vld [vmem:[#allocation6 + $0x10] sm:$0xff] }
  0x14   :  { %99 = vmatpush.msra.mxu0 %v69_v5  ;;  %v110_v20 = vld [vmem:[#allocation6 + $0x8] sm:$0xff]  ;;  %v109_v21 = vld [vmem:[#allocation6] sm:$0xff]  ;;  %v184_v22 = vld [vmem:[%s326_s2] ss:$0 sm:$0xff] }
  0x15   :  { %161 = vmatmul.msk.f32.vlgmr.msra.gmra.mxu0 %vm77_vm0, %v67_v7  ;;  %132 = vmatpush.msra.mxu1 %v121_v8  ;;  %v185_v29 = vld [vmem:[%s328_s4] ss:$0 sm:$0xff] }
  0x16   :  { %166 = vmatpush.msra.mxu2 %v121_v8 }
  0x17   :  { %133 = vmatpush.msra.mxu1 %v120_v9 }
  0x18   :  { %167 = vmatpush.msra.mxu2 %v120_v9 }
  0x19   :  { %134 = vmatpush.msra.mxu1 %v119_v10 }
  0x1a   :  { %168 = vmatpush.msra.mxu2 %v119_v10 }
  0x1b   :  { %135 = vmatpush.msra.mxu1 %v118_v11 }
  0x1c   :  { %169 = vmatpush.msra.mxu2 %v118_v11 }
  0x1d   :  { %162 = vmatmul.msk.f32.gmra.mxu0 %vm77_vm0, %v68_v12  ;;  %136 = vmatpush.msra.mxu1 %v117_v13 }
  0x1e   :  { %170 = vmatpush.msra.mxu2 %v117_v13 }
  0x1f   :  { %137 = vmatpush.msra.mxu1 %v116_v14 }
  0x20   :  { %171 = vmatpush.msra.mxu2 %v116_v14 }
  0x21   :  { %138 = vmatpush.msra.mxu1 %v115_v15 }
  0x22   :  { %172 = vmatpush.msra.mxu2 %v115_v15 }
  0x23   :  { %139 = vmatpush.msra.mxu1 %v114_v16 }
  0x24   :  { %173 = vmatpush.msra.mxu2 %v114_v16 }
  0x25   :  { %140 = vmatpush.msra.mxu1 %v113_v17 }
  0x26   :  { %174 = vmatpush.msra.mxu2 %v113_v17 }
  0x27   :  { %141 = vmatpush.msra.mxu1 %v112_v18 }
  0x28   :  { %175 = vmatpush.msra.mxu2 %v112_v18 }
  0x29   :  { %142 = vmatpush.msra.mxu1 %v111_v19 }
  0x2a   :  { %176 = vmatpush.msra.mxu2 %v111_v19 }
  0x2b   :  { %143 = vmatpush.msra.mxu1 %v110_v20 }
  0x2c   :  { %177 = vmatpush.msra.mxu2 %v110_v20 }
  0x2d   :  { %144 = vmatpush.msra.mxu1 %v109_v21 }
  0x2e   :  { %178 = vmatpush.msra.mxu2 %v109_v21 }
  0x92   :  { %v101_v23 = vpop.f32.mrf.mxu0 }
  0x93   :  { %v102_v24 = vadd.f32 %v184_v22, %v101_v23 }
  0x95   :  { %186 = vtanh.f32 %v102_v24 }
  0x9a   :  { %v104_v25 = vpop.f32.mrf.mxu0 }
  0x9b   :  { %v187_v26 = vpop.eup %186  ;;  %v105_v27 = vadd.f32 %v184_v22, %v104_v25 }
  0x9c   :  { %145 = vmatmul.f32.vlgmr.msra.gmra.mxu1 %v187_v26 }
  0x9d   :  { %188 = vtanh.f32 %v105_v27 }
  0xa3   :  { %v189_v28 = vpop.eup %188 }
  0xa4   :  { %148 = vmatmul.f32.vlgmr.msra.gmra.mxu2 %v189_v28 }
 0x119   :  { %v146_v30 = vpop.f32.mrf.mxu1 }
 0x11a   :  { %v147_v31 = vadd.f32 %v185_v29, %v146_v30 }
 0x11c   :  { %153 = vst.msk [vmem:[%s329_s5] sm:$0xff] %vm152_vm1, %v147_v31 }
 0x127   :  { %v149_v32 = vpop.f32.mrf.mxu2 }
 0x128   :  { %v150_v33 = vadd.f32 %v185_v29, %v149_v32 }
 0x12a   :  { %154 = vst.msk [vmem:[%s329_s5 + $0x8] sm:$0xff] %vm152_vm1, %v150_v33 }
 0x12b   :  { %159 = vsyncpa [#allocation3], 1 }
 0x12c   :  { %160 = vsyncpa [#allocation5], 1 }

// kernel: tpu_custom_call.1
= control target key start
LH: loop header
LB: loop body
LE: loop exit
PB: predicated region body
PF: predicated region fallthrough
CT: control target
= control target key end

     0   :  { %10 = vsyncpa [#allocation3], 0  ;;  %s324_s0 = inlined_call_operand.hbm [shape: f32[16,32], index: 0, kind: input, shape index: {}]   ;;  %s325_s1 = inlined_call_operand.hbm [shape: f32[32,128], index: 1, kind: input, shape index: {}]   ;;  %s326_s2 = inlined_call_operand.vmem [shape: f32[1,128], index: 2, kind: input, shape index: {}]   ;;  %s327_s3 = inlined_call_operand.hbm [shape: f32[128,128], index: 3, kind: input, shape index: {}]   ;;  %s328_s4 = inlined_call_operand.vmem [shape: f32[1,128], index: 4, kind: input, shape index: {}]   ;;  %s329_s5 = inlined_call_operand.vmem [shape: f32[16,8], index: 5, kind: output, shape index: {}]  }
   0x1   :  { %11 = vsyncpa [#allocation5], 0  ;;  %s29_s20 = sshll.u32 %s325_s1, 4  ;;  %s266_s21 = smov [#allocation4]   ;;  %s30_s20 = int_to_ptr.hbm [resolvable:$true] %s29_s20 }
   0x2   :  { %s31_s22 = sshll.u32 %s266_s21, 4  ;;  %s16_s25 = sshll.u32 %s324_s0, 4  ;;  %s32_s22 = int_to_ptr.vmem [resolvable:$true] %s31_s22  ;;  %s17_s25 = int_to_ptr.hbm [resolvable:$true] %s16_s25 }
   0x3   :  { %s267_s26 = smov 128   ;;  %s268_s27 = smov 8  }
   0x4   :  { %37 = dma.hbm_to_vmem [thread:$0]  %s30_s20, 512, %s32_s22, [#allocation5], %s267_s26, %s267_s26, %s268_s27  }
   0x5   :  { %s269_s28 = smov [#allocation2]   ;;  %s44_s7 = sshll.u32 %s327_s3, 4  ;;  %s45_s7 = int_to_ptr.hbm [resolvable:$true] %s44_s7 }
   0x6   :  { %s18_s29 = sshll.u32 %s269_s28, 4  ;;  %s270_s1 = smov [#allocation6]   ;;  %s19_s29 = int_to_ptr.vmem [resolvable:$true] %s18_s29 }
   0x7   :  { %24 = dma.hbm_to_vmem [thread:$0]  %s17_s25, 256, %s19_s29, [#allocation3], %s267_s26, %s267_s26, %s268_s27  }
   0x8   :  { %s46_s8 = sshll.u32 %s270_s1, 4  ;;  %s47_s8 = int_to_ptr.vmem [resolvable:$true] %s46_s8 }
   0x9   :  { %52 = dma.hbm_to_vmem [thread:$0]  %s45_s7, 2048, %s47_s8, [#allocation5], %s267_s26, %s267_s26, %s268_s27  }
   0xa   :  { %262 = dma.done.wait [#allocation3], 256  }
   0xb   :  { %263 = vsyncadd [#allocation3], 4294967040 }
   0xc   :  { %264 = dma.done.wait [#allocation5], 2560  }
   0xd   :  { %265 = vsyncadd [#allocation5], 4294964736  ;;  %v72_v0 = vld [vmem:[#allocation4 + $0x18] sm:$0xff]  ;;  %v71_v1 = vld [vmem:[#allocation4 + $0x10] sm:$0xff]  ;;  %vm77_vm0 = vcmask 261120   ;;  %vm152_vm1 = vcmask 64512  }
   0xe   :  { %96 = vmatpush.msra.mxu0 %v72_v0  ;;  %v70_v2 = vld [vmem:[#allocation4 + $0x8] sm:$0xff]  ;;  %v124_v3 = vld [vmem:[#allocation6 + $0x78] sm:$0xff]  ;;  %v123_v4 = vld [vmem:[#allocation6 + $0x70] sm:$0xff] }
   0xf   :  { %129 = vmatpush.msra.mxu1 %v124_v3  ;;  %v69_v5 = vld [vmem:[#allocation4] sm:$0xff]  ;;  %v122_v6 = vld [vmem:[#allocation6 + $0x68] sm:$0xff]  ;;  %163 = vmatpush.msra.mxu2 %v124_v3  ;;  %v67_v7 = vld [vmem:[#allocation2] sm:$0xff] }
  0x10   :  { %97 = vmatpush.msra.mxu0 %v71_v1  ;;  %v121_v8 = vld [vmem:[#allocation6 + $0x60] sm:$0xff]  ;;  %v120_v9 = vld [vmem:[#allocation6 + $0x58] sm:$0xff]  ;;  %v119_v10 = vld [vmem:[#allocation6 + $0x50] sm:$0xff] }
  0x11   :  { %130 = vmatpush.msra.mxu1 %v123_v4  ;;  %164 = vmatpush.msra.mxu2 %v123_v4  ;;  %v118_v11 = vld [vmem:[#allocation6 + $0x48] sm:$0xff]  ;;  %v68_v12 = vld [vmem:[#allocation2 + $0x8] sm:$0xff]  ;;  %v117_v13 = vld [vmem:[#allocation6 + $0x40] sm:$0xff] }
  0x12   :  { %98 = vmatpush.msra.mxu0 %v70_v2  ;;  %v116_v14 = vld [vmem:[#allocation6 + $0x38] sm:$0xff]  ;;  %v115_v15 = vld [vmem:[#allocation6 + $0x30] sm:$0xff]  ;;  %v114_v16 = vld [vmem:[#allocation6 + $0x28] sm:$0xff] }
  0x13   :  { %131 = vmatpush.msra.mxu1 %v122_v6  ;;  %165 = vmatpush.msra.mxu2 %v122_v6  ;;  %v113_v17 = vld [vmem:[#allocation6 + $0x20] sm:$0xff]  ;;  %v112_v18 = vld [vmem:[#allocation6 + $0x18] sm:$0xff]  ;;  %v111_v19 = vld [vmem:[#allocation6 + $0x10] sm:$0xff] }
  0x14   :  { %99 = vmatpush.msra.mxu0 %v69_v5  ;;  %v110_v20 = vld [vmem:[#allocation6 + $0x8] sm:$0xff]  ;;  %v109_v21 = vld [vmem:[#allocation6] sm:$0xff]  ;;  %v184_v22 = vld [vmem:[%s326_s2] ss:$0 sm:$0xff] }
  0x15   :  { %161 = vmatmul.msk.f32.vlgmr.msra.gmra.mxu0 %vm77_vm0, %v67_v7  ;;  %132 = vmatpush.msra.mxu1 %v121_v8  ;;  %v185_v29 = vld [vmem:[%s328_s4] ss:$0 sm:$0xff] }
  0x16   :  { %166 = vmatpush.msra.mxu2 %v121_v8 }
  0x17   :  { %133 = vmatpush.msra.mxu1 %v120_v9 }
  0x18   :  { %167 = vmatpush.msra.mxu2 %v120_v9 }
  0x19   :  { %134 = vmatpush.msra.mxu1 %v119_v10 }
  0x1a   :  { %168 = vmatpush.msra.mxu2 %v119_v10 }
  0x1b   :  { %135 = vmatpush.msra.mxu1 %v118_v11 }
  0x1c   :  { %169 = vmatpush.msra.mxu2 %v118_v11 }
  0x1d   :  { %162 = vmatmul.msk.f32.gmra.mxu0 %vm77_vm0, %v68_v12  ;;  %136 = vmatpush.msra.mxu1 %v117_v13 }
  0x1e   :  { %170 = vmatpush.msra.mxu2 %v117_v13 }
  0x1f   :  { %137 = vmatpush.msra.mxu1 %v116_v14 }
  0x20   :  { %171 = vmatpush.msra.mxu2 %v116_v14 }
  0x21   :  { %138 = vmatpush.msra.mxu1 %v115_v15 }
  0x22   :  { %172 = vmatpush.msra.mxu2 %v115_v15 }
  0x23   :  { %139 = vmatpush.msra.mxu1 %v114_v16 }
  0x24   :  { %173 = vmatpush.msra.mxu2 %v114_v16 }
  0x25   :  { %140 = vmatpush.msra.mxu1 %v113_v17 }
  0x26   :  { %174 = vmatpush.msra.mxu2 %v113_v17 }
  0x27   :  { %141 = vmatpush.msra.mxu1 %v112_v18 }
  0x28   :  { %175 = vmatpush.msra.mxu2 %v112_v18 }
  0x29   :  { %142 = vmatpush.msra.mxu1 %v111_v19 }
  0x2a   :  { %176 = vmatpush.msra.mxu2 %v111_v19 }
  0x2b   :  { %143 = vmatpush.msra.mxu1 %v110_v20 }
  0x2c   :  { %177 = vmatpush.msra.mxu2 %v110_v20 }
  0x2d   :  { %144 = vmatpush.msra.mxu1 %v109_v21 }
  0x2e   :  { %178 = vmatpush.msra.mxu2 %v109_v21 }
  0x92   :  { %v101_v23 = vpop.f32.mrf.mxu0 }
  0x93   :  { %v102_v24 = vadd.f32 %v184_v22, %v101_v23 }
  0x95   :  { %186 = vtanh.f32 %v102_v24 }
  0x9a   :  { %v104_v25 = vpop.f32.mrf.mxu0 }
  0x9b   :  { %v187_v26 = vpop.eup %186  ;;  %v105_v27 = vadd.f32 %v184_v22, %v104_v25 }
  0x9c   :  { %145 = vmatmul.f32.vlgmr.msra.gmra.mxu1 %v187_v26 }
  0x9d   :  { %188 = vtanh.f32 %v105_v27 }
  0xa3   :  { %v189_v28 = vpop.eup %188 }
  0xa4   :  { %148 = vmatmul.f32.vlgmr.msra.gmra.mxu2 %v189_v28 }
 0x119   :  { %v146_v30 = vpop.f32.mrf.mxu1 }
 0x11a   :  { %v147_v31 = vadd.f32 %v185_v29, %v146_v30 }
 0x11c   :  { %153 = vst.msk [vmem:[%s329_s5] sm:$0xff] %vm152_vm1, %v147_v31 }
 0x127   :  { %v149_v32 = vpop.f32.mrf.mxu2 }
 0x128   :  { %v150_v33 = vadd.f32 %v185_v29, %v149_v32 }
 0x12a   :  { %154 = vst.msk [vmem:[%s329_s5 + $0x8] sm:$0xff] %vm152_vm1, %v150_v33 }
 0x12b   :  { %159 = vsyncpa [#allocation3], 1 }
 0x12c   :  { %160 = vsyncpa [#allocation5], 1 }

</bundles_post_ra>
